<compile_context>
chip_gen: v6e
topology: v6e:2x2x1
jax: 0.10.0
libtpu: 0.0.40
codegen_flags: <defaults>
</compile_context>

<pallas_src>
import functools

import jax
import jax.numpy as jnp
from jax.experimental import pallas as pl
from jax.experimental.pallas import tpu as pltpu


# The 9 source-tap shifts of the 3x3 kernel at original resolution.  For output
# phase (a, b) the effective 2x2 kernel's tap (dr, dc) reads source offset
# (a + dr - 1, b + dc - 1), so shift (roff, coff) is used by phase (a, b) iff
# dr = roff - a + 1 and dc = coff - b + 1 are both in {0, 1}.
_SHIFTS = tuple((r, c) for r in (-1, 0, 1) for c in (-1, 0, 1))


def _phases_for(roff, coff):
    out = []
    for a in (0, 1):
        dr = roff - a + 1
        if dr not in (0, 1):
            continue
        for b in (0, 1):
            dc = coff - b + 1
            if dc not in (0, 1):
                continue
            out.append((a, b, dr, dc))
    return out


def _pick_band_rows(H0, W0, max_band_lanes=2048):
    """Largest row-band Hb with Hb | H0, Hb*W0 % 128 == 0 (lane-dense blocks)
    and Hb*W0 <= max_band_lanes; prefers >= 2 bands (pipelining / megacore).
    Falls back to the whole image (full-dim blocks stay legal).
    TODO(synk): lower max_band_lanes on v5e (16 MiB default scoped VMEM)."""
    cands = [h for h in range(1, H0 + 1)
             if H0 % h == 0 and (h * W0) % 128 == 0 and h * W0 <= max_band_lanes]
    if not cands:
        return H0
    multi = [h for h in cands if H0 // h >= 2]
    return max(multi) if multi else max(cands)


def _up_conv_band_kernel(x_ref, w_ref, bias_ref, o_ref, *, W0, Hb, Cout, k_stacked):
    """One (image, band) tile per grid step.

    x_ref:    (1, 1, Cin_p, WIN)  band window, WIN = (Hb+4)*W0: padded rows
                                  [band*Hb, band*Hb+Hb+4) of the 2-row-padded
                                  image (bf16, zero-padded channels).
    w_ref:    per_shift: (16*Cout, Cin_p)  shift-major stacked phase weights
              k_stacked: (4*Cout, 9*Cin_p) phase-major LHS over all 9 taps
              (BatchNorm scale already folded in, bf16).
    bias_ref: (Cout, 1) f32       folded conv bias + BN shift.
    o_ref:    (1, 4, Cout, BAND)  phase-major output band, BAND = Hb*W0 (bf16).
    """
    BAND = Hb * W0

    # Column boundary masks for the implicit zero padding (row boundaries are
    # handled by the physical 2-row pad in the window).  Hoisted, computed once.
    col = jax.lax.broadcasted_iota(jnp.int32, (1, BAND), 1) % W0
    mask_l = (col >= 1).astype(jnp.bfloat16)          # source col j-1 in bounds
    mask_r = (col < (W0 - 1)).astype(jnp.bfloat16)    # source col j+1 in bounds

    def tap(roff, coff):
        # Output position m reads source (row_local + roff, col + coff), i.e.
        # window flat index (2+roff)*W0 + coff + m  --  a *static* slice.
        start = (2 + roff) * W0 + coff
        rhs = x_ref[0, 0, :, start:start + BAND]      # (Cin_p, BAND) bf16
        if coff == -1:
            rhs = rhs * mask_l
        elif coff == 1:
            rhs = rhs * mask_r
        return rhs

    bias = bias_ref[...].astype(jnp.float32)          # (Cout, 1)

    if k_stacked:
        # Thin-channel path: one matmul with K = 9*Cin_p.
        big_rhs = jnp.concatenate([tap(r, c) for (r, c) in _SHIFTS], axis=0)
        prod = jnp.dot(w_ref[...], big_rhs,
                       preferred_element_type=jnp.float32)      # (4*Cout, BAND)
        for p in range(4):
            o_ref[0, p] = jnp.maximum(
                prod[p * Cout:(p + 1) * Cout, :] + bias, 0.0).astype(o_ref.dtype)
    else:
        # Wide-channel path: 9 matmuls, phases sharing a shift stacked in the LHS.
        acc0 = jnp.broadcast_to(bias, (Cout, BAND))
        accs = [acc0, acc0, acc0, acc0]
        row_off = 0
        for (roff, coff) in _SHIFTS:
            plist = _phases_for(roff, coff)
            rows = len(plist) * Cout
            w_s = w_ref[row_off:row_off + rows, :]               # (rows, Cin_p)
            prod = jnp.dot(w_s, tap(roff, coff),
                           preferred_element_type=jnp.float32)   # (rows, BAND)
            for i, (a, b, _, _) in enumerate(plist):
                p = 2 * a + b
                accs[p] = accs[p] + prod[i * Cout:(i + 1) * Cout, :]
            row_off += rows
        for p in range(4):
            o_ref[0, p] = jnp.maximum(accs[p], 0.0).astype(o_ref.dtype)


def up_conv_forward(x_nchw, W_do, D_do, conv_bias, gamma, beta,
                    running_mean, running_var, eps=1e-5,
                    mxu_mode="auto", max_band_lanes=2048):
    """Inference forward of up_conv: Upsample(x2 nearest) -> DOConv2d(3x3, pad 1,
    bias) -> BatchNorm2d(running stats) -> ReLU -> Dropout(identity in eval).
    Input/output are NCHW float32 (PyTorch convention)."""
    N, Cin, H0, W0 = x_nchw.shape
    Cout = W_do.shape[0]
    S0 = H0 * W0

    Hb = _pick_band_rows(H0, W0, max_band_lanes)
    n_bands = H0 // Hb
    BAND = Hb * W0
    WIN = (Hb + 4) * W0                      # band + 2 halo/pad rows each side
    Cin_p = -(-Cin // 16) * 16               # bf16-friendly sublane padding

    if mxu_mode == "auto":
        mxu_mode = "k_stacked" if 9 * Cin_p <= 256 else "per_shift"
    k_stacked = (mxu_mode == "k_stacked")

    # --- parameter glue (tiny, no full-tensor passes) -------------------------
    # DOConv weight composition: DoW[o,c,k] = sum_d W[o,c,d] * D[c,k,d]
    DoW = jnp.einsum('ocd,ckd->ock', W_do, D_do).reshape(Cout, Cin, 3, 3)
    scale = gamma / jnp.sqrt(running_var + eps)                        # (Cout,)
    bias = (beta + scale * (conv_bias - running_mean)).reshape(Cout, 1)
    bias = bias.astype(jnp.float32)
    w_eff = DoW * scale[:, None, None, None]        # fold BN scale into weights

    # Subpixel decomposition of (nearest x2 upsample -> 3x3 conv, pad=1):
    # phase (a,b) is a 2x2 conv with taps at source offsets (a+dr-1, b+dc-1);
    # the effective kernels are partial row/col sums of the 3x3 kernel (rows of A).
    A = jnp.array([[[1., 0., 0.], [0., 1., 1.]],        # a = 0
                   [[1., 1., 0.], [0., 0., 1.]]],       # a = 1
                  dtype=w_eff.dtype)
    w_phase = jnp.einsum('adh,bew,ochw->abdeoc', A, A, w_eff)  # (2,2,2,2,Cout,Cin)

    pad_c = ((0, 0), (0, Cin_p - Cin))
    if k_stacked:
        # Phase-major rows, K = shift-major x Cin_p (zeros where unused).
        rows = []
        for p in range(4):
            a, b = divmod(p, 2)
            kblocks = []
            for (roff, coff) in _SHIFTS:
                dr, dc = roff - a + 1, coff - b + 1
                if dr in (0, 1) and dc in (0, 1):
                    blk = w_phase[a, b, dr, dc]
                else:
                    blk = jnp.zeros((Cout, Cin), w_phase.dtype)
                kblocks.append(jnp.pad(blk, pad_c))
            rows.append(jnp.concatenate(kblocks, axis=1))       # (Cout, 9*Cin_p)
        w_all = jnp.concatenate(rows, axis=0)                   # (4*Cout, 9*Cin_p)
    else:
        # Shift-major stacked phase slabs (9 matmuls of M = n_phases*Cout each).
        slabs = []
        for (roff, coff) in _SHIFTS:
            for (a, b, dr, dc) in _phases_for(roff, coff):
                slabs.append(jnp.pad(w_phase[a, b, dr, dc], pad_c))
        w_all = jnp.concatenate(slabs, axis=0)                  # (16*Cout, Cin_p)
    w_all = w_all.astype(jnp.bfloat16)

    # --- input: bf16 cast, channel pad, 2-row zero pad, banded halo windows ---
    xb = x_nchw.astype(jnp.bfloat16)
    xb = jnp.pad(xb, ((0, 0), (0, Cin_p - Cin), (2, 2), (0, 0)))
    xb = xb.reshape(N, Cin_p, (H0 + 4) * W0)
    # Band b reads padded rows [b*Hb, b*Hb + Hb + 4); materialise the halo'd
    # windows once (one small ~(Hb+4)/Hb x input-sized pass) so the kernel's
    # input blocks are plain, non-overlapping, auto-pipelined BlockSpec tiles.
    # TODO(synk): for very large n_bands use a gather / in-kernel make_async_copy.
    x_win = jnp.stack(
        [xb[:, :, b * BAND: b * BAND + WIN] for b in range(n_bands)], axis=1)
    # (N, n_bands, Cin_p, WIN)

    kernel = functools.partial(_up_conv_band_kernel, W0=W0, Hb=Hb, Cout=Cout,
                               k_stacked=k_stacked)
    out = pl.pallas_call(
        kernel,
        out_shape=jax.ShapeDtypeStruct((N, 4, Cout, S0), jnp.bfloat16),
        grid=(N, n_bands),
        in_specs=[
            pl.BlockSpec((1, 1, Cin_p, WIN), lambda n, b: (n, b, 0, 0)),
            pl.BlockSpec(w_all.shape, lambda n, b: (0, 0)),
            pl.BlockSpec((Cout, 1), lambda n, b: (0, 0)),
        ],
        out_specs=pl.BlockSpec((1, 4, Cout, BAND), lambda n, b: (n, 0, 0, b)),
        compiler_params=pltpu.CompilerParams(
            dimension_semantics=("parallel", "parallel"),
            vmem_limit_bytes=48 * 1024 * 1024),
    )(x_win, w_all, bias)

    # Phase interleave: (N, a, b, Cout, H0, W0) -> (N, Cout, 2H0, 2W0).
    # One output-sized transpose; kernel emits bf16 so this pass reads half the
    # bytes and the f32 cast fuses into its write.
    out = out.reshape(N, 2, 2, Cout, H0, W0)
    out = jnp.transpose(out, (0, 3, 4, 1, 5, 2))      # (N, Cout, H0, 2, W0, 2)
    return out.reshape(N, Cout, 2 * H0, 2 * W0).astype(jnp.float32)


def _reference(x_nchw, W_do, D_do, conv_bias, gamma, beta,
               running_mean, running_var, eps=1e-5):
    """Pure-JAX reference (upsample -> DOConv -> BN(eval) -> ReLU)."""
    Cout, Cin = W_do.shape[0], W_do.shape[1]
    DoW = jnp.einsum('ocd,ckd->ock', W_do, D_do).reshape(Cout, Cin, 3, 3)
    x = jnp.repeat(jnp.repeat(x_nchw, 2, axis=2), 2, axis=3)
    y = jax.lax.conv_general_dilated(
        x, DoW, window_strides=(1, 1), padding='SAME',
        dimension_numbers=('NCHW', 'OIHW', 'NCHW'))
    y = y + conv_bias[None, :, None, None]
    s = gamma / jnp.sqrt(running_var + eps)
    y = s[None, :, None, None] * (y - running_mean[None, :, None, None]) \
        + beta[None, :, None, None]
    return jnp.maximum(y, 0.0)


if __name__ == "__main__":
    key = jax.random.PRNGKey(0)
    N, CH_IN, CH_OUT, H0, W0 = 2, 4, 8, 16, 16
    D_MUL = 9     # DOConv default D_mul = kernel_h * kernel_w

    ks = jax.random.split(key, 8)
    x = jax.random.normal(ks[0], (N, CH_IN, H0, W0), jnp.float32)
    W_do = jax.random.normal(ks[1], (CH_OUT, CH_IN, D_MUL), jnp.float32) * 0.1
    D_do = jax.random.normal(ks[2], (CH_IN, 9, D_MUL), jnp.float32) * 0.1
    conv_bias = jax.random.normal(ks[3], (CH_OUT,), jnp.float32) * 0.1
    gamma = 1.0 + 0.1 * jax.random.normal(ks[4], (CH_OUT,), jnp.float32)
    beta = 0.1 * jax.random.normal(ks[5], (CH_OUT,), jnp.float32)
    running_mean = 0.1 * jax.random.normal(ks[6], (CH_OUT,), jnp.float32)
    running_var = jnp.abs(jax.random.normal(ks[7], (CH_OUT,), jnp.float32)) + 0.5

    ref = _reference(x, W_do, D_do, conv_bias, gamma, beta,
                     running_mean, running_var)

    # Exercise both MXU layouts: the thin-channel K-stacked path (what "auto"
    # picks at Cin=4) and the wide-channel per-shift stacked-LHS path.
    for mode in ("k_stacked", "per_shift"):
        fwd = jax.jit(functools.partial(up_conv_forward, mxu_mode=mode))
        out = jax.block_until_ready(
            fwd(x, W_do, D_do, conv_bias, gamma, beta, running_mean, running_var))
        assert out.shape == (N, CH_OUT, 2 * H0, 2 * W0), (mode, out.shape)
        err = float(jnp.max(jnp.abs(out - ref)))
        # bf16 MXU operands (intentional, per the perf review) => a few e-3
        # absolute difference vs the f32 XLA conv reference is expected.
        assert jnp.allclose(out, ref, atol=2e-2, rtol=2e-2), (mode, err)

    print("KERNEL_OK")
</pallas_src>

<mosaic_0001>
module attributes {stable_mosaic.version = 11 : i64} {
  func.func @_up_conv_band_kernel(%arg0: i32, %arg1: i32, %arg2: memref<1x1x16x192xbf16, #tpu.memory_space<vmem>>, %arg3: memref<32x144xbf16, #tpu.memory_space<vmem>>, %arg4: memref<8x1xf32, #tpu.memory_space<vmem>>, %arg5: memref<1x4x8x128xbf16, #tpu.memory_space<vmem>>) attributes {dimension_semantics = [#tpu.dimension_semantics<parallel>, #tpu.dimension_semantics<parallel>], iteration_bounds = array<i64: 2, 2>, scalar_prefetch = 0 : i64, scratch_operands = 0 : i64, tpu.core_type = #tpu.core_type<tc>, window_params = [{transform_indices = @transform_0, window_bounds = array<i64: 1, 1, 16, 192>}, {pipeline_mode = #tpu.pipeline_mode<synchronous>, transform_indices = @transform_1, window_bounds = array<i64: 32, 144>}, {pipeline_mode = #tpu.pipeline_mode<synchronous>, transform_indices = @transform_2, window_bounds = array<i64: 8, 1>}, {transform_indices = @transform_3, window_bounds = array<i64: 1, 4, 8, 128>}]} {
    %0 = tpu.iota {dimensions = array<i32: 1>} : vector<1x128xi32>
    %c16_i32 = arith.constant 16 : i32
    %c0_i32 = arith.constant 0 : i32
    %1 = arith.cmpi eq, %c16_i32, %c0_i32 : i32
    %c1_i32 = arith.constant 1 : i32
    %2 = arith.select %1, %c1_i32, %c16_i32 : i32
    %3 = vector.broadcast %2 : i32 to vector<1x128xi32>
    %4 = arith.remsi %0, %3 : vector<1x128xi32>
    %c0_i32_0 = arith.constant 0 : i32
    %5 = vector.broadcast %c0_i32_0 : i32 to vector<1x128xi32>
    %6 = arith.cmpi ne, %4, %5 : vector<1x128xi32>
    %c0_i32_1 = arith.constant 0 : i32
    %7 = vector.broadcast %c0_i32_1 : i32 to vector<1x128xi32>
    %8 = arith.cmpi slt, %4, %7 : vector<1x128xi32>
    %c0_i32_2 = arith.constant 0 : i32
    %9 = arith.cmpi slt, %2, %c0_i32_2 : i32
    %10 = vector.broadcast %9 : i1 to vector<1x128xi1>
    %11 = vector.broadcast %10 : vector<1x128xi1> to vector<1x128xi1>
    %12 = arith.xori %8, %11 : vector<1x128xi1>
    %13 = arith.andi %12, %6 : vector<1x128xi1>
    %14 = vector.broadcast %2 : i32 to vector<1x128xi32>
    %15 = arith.addi %4, %14 : vector<1x128xi32>
    %16 = arith.select %13, %15, %4 : vector<1x128xi1>, vector<1x128xi32>
    %c1_i32_3 = arith.constant 1 : i32
    %17 = vector.broadcast %c1_i32_3 : i32 to vector<1x128xi32>
    %18 = arith.cmpi sge, %16, %17 : vector<1x128xi32>
    %19 = arith.extui %18 : vector<1x128xi1> to vector<1x128xi32>
    %20 = arith.sitofp %19 : vector<1x128xi32> to vector<1x128xf32>
    %21 = arith.truncf %20 : vector<1x128xf32> to vector<1x128xbf16>
    %c15_i32 = arith.constant 15 : i32
    %22 = vector.broadcast %c15_i32 : i32 to vector<1x128xi32>
    %23 = arith.cmpi slt, %16, %22 : vector<1x128xi32>
    %24 = arith.extui %23 : vector<1x128xi1> to vector<1x128xi32>
    %25 = arith.sitofp %24 : vector<1x128xi32> to vector<1x128xf32>
    %26 = arith.truncf %25 : vector<1x128xf32> to vector<1x128xbf16>
    %c0 = arith.constant 0 : index
    %c0_4 = arith.constant 0 : index
    %27 = vector.load %arg4[%c0, %c0_4] : memref<8x1xf32, #tpu.memory_space<vmem>>, vector<8x1xf32>
    %c0_5 = arith.constant 0 : index
    %c0_6 = arith.constant 0 : index
    %c0_7 = arith.constant 0 : index
    %c15 = arith.constant 15 : index
    %28 = vector.load %arg2[%c0_5, %c0_6, %c0_7, %c15] : memref<1x1x16x192xbf16, #tpu.memory_space<vmem>>, vector<1x1x16x128xbf16>
    %29 = vector.shape_cast %28 : vector<1x1x16x128xbf16> to vector<16x128xbf16>
    %30 = vector.broadcast %21 : vector<1x128xbf16> to vector<16x128xbf16>
    %31 = arith.mulf %29, %30 : vector<16x128xbf16>
    %c0_8 = arith.constant 0 : index
    %c0_9 = arith.constant 0 : index
    %c0_10 = arith.constant 0 : index
    %c16 = arith.constant 16 : index
    %32 = vector.load %arg2[%c0_8, %c0_9, %c0_10, %c16] : memref<1x1x16x192xbf16, #tpu.memory_space<vmem>>, vector<1x1x16x128xbf16>
    %33 = vector.shape_cast %32 : vector<1x1x16x128xbf16> to vector<16x128xbf16>
    %c0_11 = arith.constant 0 : index
    %c0_12 = arith.constant 0 : index
    %c0_13 = arith.constant 0 : index
    %c17 = arith.constant 17 : index
    %34 = vector.load %arg2[%c0_11, %c0_12, %c0_13, %c17] : memref<1x1x16x192xbf16, #tpu.memory_space<vmem>>, vector<1x1x16x128xbf16>
    %35 = vector.shape_cast %34 : vector<1x1x16x128xbf16> to vector<16x128xbf16>
    %36 = vector.broadcast %26 : vector<1x128xbf16> to vector<16x128xbf16>
    %37 = arith.mulf %35, %36 : vector<16x128xbf16>
    %c0_14 = arith.constant 0 : index
    %c0_15 = arith.constant 0 : index
    %c0_16 = arith.constant 0 : index
    %c31 = arith.constant 31 : index
    %38 = vector.load %arg2[%c0_14, %c0_15, %c0_16, %c31] : memref<1x1x16x192xbf16, #tpu.memory_space<vmem>>, vector<1x1x16x128xbf16>
    %39 = vector.shape_cast %38 : vector<1x1x16x128xbf16> to vector<16x128xbf16>
    %40 = vector.broadcast %21 : vector<1x128xbf16> to vector<16x128xbf16>
    %41 = arith.mulf %39, %40 : vector<16x128xbf16>
    %c0_17 = arith.constant 0 : index
    %c0_18 = arith.constant 0 : index
    %c0_19 = arith.constant 0 : index
    %c32 = arith.constant 32 : index
    %42 = vector.load %arg2[%c0_17, %c0_18, %c0_19, %c32] : memref<1x1x16x192xbf16, #tpu.memory_space<vmem>>, vector<1x1x16x128xbf16>
    %43 = vector.shape_cast %42 : vector<1x1x16x128xbf16> to vector<16x128xbf16>
    %c0_20 = arith.constant 0 : index
    %c0_21 = arith.constant 0 : index
    %c0_22 = arith.constant 0 : index
    %c33 = arith.constant 33 : index
    %44 = vector.load %arg2[%c0_20, %c0_21, %c0_22, %c33] : memref<1x1x16x192xbf16, #tpu.memory_space<vmem>>, vector<1x1x16x128xbf16>
    %45 = vector.shape_cast %44 : vector<1x1x16x128xbf16> to vector<16x128xbf16>
    %46 = vector.broadcast %26 : vector<1x128xbf16> to vector<16x128xbf16>
    %47 = arith.mulf %45, %46 : vector<16x128xbf16>
    %c0_23 = arith.constant 0 : index
    %c0_24 = arith.constant 0 : index
    %c0_25 = arith.constant 0 : index
    %c47 = arith.constant 47 : index
    %48 = vector.load %arg2[%c0_23, %c0_24, %c0_25, %c47] : memref<1x1x16x192xbf16, #tpu.memory_space<vmem>>, vector<1x1x16x128xbf16>
    %49 = vector.shape_cast %48 : vector<1x1x16x128xbf16> to vector<16x128xbf16>
    %50 = vector.broadcast %21 : vector<1x128xbf16> to vector<16x128xbf16>
    %51 = arith.mulf %49, %50 : vector<16x128xbf16>
    %c0_26 = arith.constant 0 : index
    %c0_27 = arith.constant 0 : index
    %c0_28 = arith.constant 0 : index
    %c48 = arith.constant 48 : index
    %52 = vector.load %arg2[%c0_26, %c0_27, %c0_28, %c48] : memref<1x1x16x192xbf16, #tpu.memory_space<vmem>>, vector<1x1x16x128xbf16>
    %53 = vector.shape_cast %52 : vector<1x1x16x128xbf16> to vector<16x128xbf16>
    %c0_29 = arith.constant 0 : index
    %c0_30 = arith.constant 0 : index
    %c0_31 = arith.constant 0 : index
    %c49 = arith.constant 49 : index
    %54 = vector.load %arg2[%c0_29, %c0_30, %c0_31, %c49] : memref<1x1x16x192xbf16, #tpu.memory_space<vmem>>, vector<1x1x16x128xbf16>
    %55 = vector.shape_cast %54 : vector<1x1x16x128xbf16> to vector<16x128xbf16>
    %56 = vector.broadcast %26 : vector<1x128xbf16> to vector<16x128xbf16>
    %57 = arith.mulf %55, %56 : vector<16x128xbf16>
    %58 = tpu.concatenate %31, %33, %37, %41, %43, %47, %51, %53, %57 in 0 : vector<16x128xbf16>, vector<16x128xbf16>, vector<16x128xbf16>, vector<16x128xbf16>, vector<16x128xbf16>, vector<16x128xbf16>, vector<16x128xbf16>, vector<16x128xbf16>, vector<16x128xbf16> -> vector<144x128xbf16>
    %c0_32 = arith.constant 0 : index
    %c0_33 = arith.constant 0 : index
    %59 = vector.load %arg3[%c0_32, %c0_33] : memref<32x144xbf16, #tpu.memory_space<vmem>>, vector<32x144xbf16>
    %cst = arith.constant dense<0.000000e+00> : vector<32x128xf32>
    %60 = tpu.matmul %59, %58, %cst {dimension_numbers = #tpu.dot_dimension_numbers<[1], [0], [0], [1], [0, 0, 1, 1], [], []>} : vector<32x144xbf16>, vector<144x128xbf16>, vector<32x128xf32> -> vector<32x128xf32>
    %61 = vector.extract_strided_slice %60 {offsets = [0, 0], sizes = [8, 128], strides = [1, 1]} : vector<32x128xf32> to vector<8x128xf32>
    %62 = vector.broadcast %27 : vector<8x1xf32> to vector<8x128xf32>
    %63 = arith.addf %61, %62 : vector<8x128xf32>
    %cst_34 = arith.constant 0.000000e+00 : f32
    %64 = vector.broadcast %cst_34 : f32 to vector<8x128xf32>
    %65 = arith.maximumf %63, %64 : vector<8x128xf32>
    %66 = arith.truncf %65 : vector<8x128xf32> to vector<8x128xbf16>
    %c0_35 = arith.constant 0 : index
    %c0_36 = arith.constant 0 : index
    %c0_37 = arith.constant 0 : index
    %c0_38 = arith.constant 0 : index
    %67 = vector.load %arg5[%c0_35, %c0_36, %c0_37, %c0_38] : memref<1x4x8x128xbf16, #tpu.memory_space<vmem>>, vector<1x1x8x128xbf16>
    %68 = vector.shape_cast %67 : vector<1x1x8x128xbf16> to vector<8x128xbf16>
    %69 = vector.shape_cast %66 : vector<8x128xbf16> to vector<1x1x8x128xbf16>
    tpu.vector_store %arg5[%c0_35, %c0_36, %c0_37, %c0_38], %69 {strides = array<i32>} : memref<1x4x8x128xbf16, #tpu.memory_space<vmem>>, vector<1x1x8x128xbf16>,
    %70 = vector.extract_strided_slice %60 {offsets = [8, 0], sizes = [8, 128], strides = [1, 1]} : vector<32x128xf32> to vector<8x128xf32>
    %71 = vector.broadcast %27 : vector<8x1xf32> to vector<8x128xf32>
    %72 = arith.addf %70, %71 : vector<8x128xf32>
    %cst_39 = arith.constant 0.000000e+00 : f32
    %73 = vector.broadcast %cst_39 : f32 to vector<8x128xf32>
    %74 = arith.maximumf %72, %73 : vector<8x128xf32>
    %75 = arith.truncf %74 : vector<8x128xf32> to vector<8x128xbf16>
    %c0_40 = arith.constant 0 : index
    %c1 = arith.constant 1 : index
    %c0_41 = arith.constant 0 : index
    %c0_42 = arith.constant 0 : index
    %76 = vector.load %arg5[%c0_40, %c1, %c0_41, %c0_42] : memref<1x4x8x128xbf16, #tpu.memory_space<vmem>>, vector<1x1x8x128xbf16>
    %77 = vector.shape_cast %76 : vector<1x1x8x128xbf16> to vector<8x128xbf16>
    %78 = vector.shape_cast %75 : vector<8x128xbf16> to vector<1x1x8x128xbf16>
    tpu.vector_store %arg5[%c0_40, %c1, %c0_41, %c0_42], %78 {strides = array<i32>} : memref<1x4x8x128xbf16, #tpu.memory_space<vmem>>, vector<1x1x8x128xbf16>,
    %79 = vector.extract_strided_slice %60 {offsets = [16, 0], sizes = [8, 128], strides = [1, 1]} : vector<32x128xf32> to vector<8x128xf32>
    %80 = vector.broadcast %27 : vector<8x1xf32> to vector<8x128xf32>
    %81 = arith.addf %79, %80 : vector<8x128xf32>
    %cst_43 = arith.constant 0.000000e+00 : f32
    %82 = vector.broadcast %cst_43 : f32 to vector<8x128xf32>
    %83 = arith.maximumf %81, %82 : vector<8x128xf32>
    %84 = arith.truncf %83 : vector<8x128xf32> to vector<8x128xbf16>
    %c0_44 = arith.constant 0 : index
    %c2 = arith.constant 2 : index
    %c0_45 = arith.constant 0 : index
    %c0_46 = arith.constant 0 : index
    %85 = vector.load %arg5[%c0_44, %c2, %c0_45, %c0_46] : memref<1x4x8x128xbf16, #tpu.memory_space<vmem>>, vector<1x1x8x128xbf16>
    %86 = vector.shape_cast %85 : vector<1x1x8x128xbf16> to vector<8x128xbf16>
    %87 = vector.shape_cast %84 : vector<8x128xbf16> to vector<1x1x8x128xbf16>
    tpu.vector_store %arg5[%c0_44, %c2, %c0_45, %c0_46], %87 {strides = array<i32>} : memref<1x4x8x128xbf16, #tpu.memory_space<vmem>>, vector<1x1x8x128xbf16>,
    %88 = vector.extract_strided_slice %60 {offsets = [24, 0], sizes = [8, 128], strides = [1, 1]} : vector<32x128xf32> to vector<8x128xf32>
    %89 = vector.broadcast %27 : vector<8x1xf32> to vector<8x128xf32>
    %90 = arith.addf %88, %89 : vector<8x128xf32>
    %cst_47 = arith.constant 0.000000e+00 : f32
    %91 = vector.broadcast %cst_47 : f32 to vector<8x128xf32>
    %92 = arith.maximumf %90, %91 : vector<8x128xf32>
    %93 = arith.truncf %92 : vector<8x128xf32> to vector<8x128xbf16>
    %c0_48 = arith.constant 0 : index
    %c3 = arith.constant 3 : index
    %c0_49 = arith.constant 0 : index
    %c0_50 = arith.constant 0 : index
    %94 = vector.load %arg5[%c0_48, %c3, %c0_49, %c0_50] : memref<1x4x8x128xbf16, #tpu.memory_space<vmem>>, vector<1x1x8x128xbf16>
    %95 = vector.shape_cast %94 : vector<1x1x8x128xbf16> to vector<8x128xbf16>
    %96 = vector.shape_cast %93 : vector<8x128xbf16> to vector<1x1x8x128xbf16>
    tpu.vector_store %arg5[%c0_48, %c3, %c0_49, %c0_50], %96 {strides = array<i32>} : memref<1x4x8x128xbf16, #tpu.memory_space<vmem>>, vector<1x1x8x128xbf16>,
    return
  }
  func.func @transform_0(%arg0: i32, %arg1: i32) -> (i32, i32, i32, i32) {
    %c0_i32 = arith.constant 0 : i32
    %c0_i32_0 = arith.constant 0 : i32
    %c0_i32_1 = arith.constant 0 : i32
    return %arg0, %arg1, %c0_i32, %c0_i32_0 : i32, i32, i32, i32
  }
  func.func @transform_1(%arg0: i32, %arg1: i32) -> (i32, i32) {
    %c0_i32 = arith.constant 0 : i32
    %c0_i32_0 = arith.constant 0 : i32
    %c0_i32_1 = arith.constant 0 : i32
    return %c0_i32, %c0_i32_0 : i32, i32
  }
  func.func @transform_2(%arg0: i32, %arg1: i32) -> (i32, i32) {
    %c0_i32 = arith.constant 0 : i32
    %c0_i32_0 = arith.constant 0 : i32
    %c0_i32_1 = arith.constant 0 : i32
    return %c0_i32, %c0_i32_0 : i32, i32
  }
  func.func @transform_3(%arg0: i32, %arg1: i32) -> (i32, i32, i32, i32) {
    %c0_i32 = arith.constant 0 : i32
    %c0_i32_0 = arith.constant 0 : i32
    %c0_i32_1 = arith.constant 0 : i32
    return %arg0, %c0_i32, %c0_i32_0, %arg1 : i32, i32, i32, i32
  }
}

</mosaic_0001>

<bundles_post_ra>
// kernel: up_conv_forward.1
= control target key start
LH: loop header
LB: loop body
LE: loop exit
PB: predicated region body
PF: predicated region fallthrough
CT: control target
= control target key end

     0   :  { %s918_s12 = smov 0   ;;  %s920_s13 = smov 0   ;;  %s1106_s0 = inlined_call_operand.vmem [shape: bf16[2,2,16,192], index: 0, kind: input, shape index: {}]   ;;  %s1107_s1 = inlined_call_operand.vmem [shape: bf16[32,144], index: 1, kind: input, shape index: {}]   ;;  %s1108_s2 = inlined_call_operand.vmem [shape: f32[8,1], index: 2, kind: input, shape index: {}]   ;;  %s1109_s3 = inlined_call_operand.vmem [shape: bf16[2,4,8,256], index: 3, kind: output, shape index: {}]  }
   0x1   :  { %s922_s14 = smov 0   ;;  %s924_s15 = smov 0  }
   0x2   :  { %s926_s16 = smov 0   ;;  %s928_s17 = smov 0  }
   0x3   :  { %s930_s18 = smov 0  }
   0x4 LB: > { %s22_s19 = sadd.s32 1, %s871_s16  ;;  %s25_s20 = sadd.s32 1, %s875_s17  ;;  %s879_s18 = sphi %s930_s18, %s13_s18   ;;  %s875_s17 = sphi %s928_s17, %s1116_s17   ;;  %s871_s16 = sphi %s926_s16, %s1115_s16   ;;  %s867_s15 = sphi %s924_s15, %s1114_s15   ;;  %s863_s14 = sphi %s922_s14, %s1113_s14   ;;  %s859_s13 = sphi %s920_s13, %s1112_s13   ;;  %s855_s12 = sphi %s918_s12, %s1111_s12  }
   0x5   : > { %p23_p0 = scmp.ge.s32.totalorder %s22_s19, 2  ;;  %s671_s21 = sadd.s32 4294967295, %s879_s18  }
   0x6   : > { %p114_p1 = scmp.ne.s32.totalorder %s859_s13, %s855_s12  ;;  %p115_p2 = scmp.eq.s32.totalorder %s671_s21, 3 }
   0x7   : > { %s1118_s19 = smov (%p23_p0, %s22_s19), 0  ;;  %s1120_s20 = smov (!%p23_p0, %s25_s20), %s875_s17 }
   0x8   : > { %s100_s22 = ssub.s32 %s871_s16, %s1118_s19  ;;  %p27_p3 = scmp.ge.s32.totalorder %s1120_s20, 2 }
   0x9   : > { %p675_p4 = scmp.ge.s32.totalorder %s879_s18, 1  ;;  %p964_p5 = por %p115_p2, %p114_p1 }
   0xa   : > { %p157_p6 = scmp.lt.s32.totalorder %s879_s18, 5  ;;  %s1122_s20 = smov (%p27_p3, %s1120_s20), 0 }
   0xb   : > { %s99_s24 = ssub.s32 %s875_s17, %s1122_s20  ;;  %s104_s26 = sadd.s32 1, %s859_s13 }
   0xc   : > { %p158_p7 = pnand %p675_p4, %p157_p6  ;;  %s101_s25 = sor.u32 %s100_s22, %s99_s24 }
   0xd   : > { %p102_p8 = scmp.eq.s32.totalorder %s101_s25, 0  ;;  %p184_p9 = scmp.lt.s32.totalorder (!%p158_p7), %s867_s15, 1 }
   0xe   : > { %161 = sbr.rel (%p158_p7) target bundleno = 627 (0x273), region = 32  ;;  %p186_p10 = scmp.lt.s32.totalorder (!%p158_p7), %s863_s14, 1 }
   0xf   : > { %s975_s27 = scalar_select %p102_p8, %s859_s13, %s104_s26  }
  0x10   : > { %s882_s7 = smov (!%p158_p7), 47   ;;  %s883_s8 = smov (!%p158_p7), 31  }
  0x11   : > { %s884_s21 = smov (!%p158_p7), 33   ;;  %s885_s22 = smov (!%p158_p7), 17  }
  0x12   : > { %s886_s24 = smov (!%p158_p7), 49   ;;  %s887_s25 = smov (!%p158_p7), 95  }
  0x13   : > { %v194_v0 = vlaneseq  ;;  %s185_s28 = scalar_select %p184_p9, %s867_s15, 1  ;;  %v881_v3 = vmov 0.0   ;;  %vm260_vm2 = vcmask 384000   ;;  %vm252_vm3 = vcmask 269312  }
  0x14   : > { %s187_s29 = scalar_select %p186_p10, %s863_s14, 1  ;;  %vm244_vm4 = vcmask 252928   ;;  %vm236_vm5 = vcmask 138240   ;;  %vm268_vm6 = vcmask 400384   ;;  %v894_v45 = vmov 0  }
  0x15   : > { %v195_v1 = vand.u32 127, %v194_v0  ;;  %s678_s30 = sshll.u32 %s185_s28, 3  ;;  %s888_s26 = smov 111   ;;  %461 = vmatprep.subr.bf16.mxu0 %v894_v45  ;;  %725 = vmatprep.subr.bf16.mxu1 %v894_v45  ;;  %vm361_vm7 = vcmask 777216   ;;  %vm355_vm8 = vcmask 785408   ;;  %vm341_vm9 = vcmask 900096  }
  0x16   : > { %s677_s4 = sshll.u32 %s187_s29, 2  ;;  %s889_s28 = smov 96   ;;  %816 = vset.pattern.permute.xlu0 %v894_v45  ;;  %vm327_vm10 = vcmask 908288   ;;  %vm321_vm11 = vcmask 916480   ;;  %vm225_vm12 = vcmask 121856   ;;  %vm307_vm13 = vcmask 1031168  }
  0x17   : > { %v200_v2 = vand.u32 15, %v195_v1  ;;  %s190_s5 = sadd.s32 %s678_s30, %s677_s4  ;;  %s890_s29 = smov 110   ;;  %vm293_vm14 = vcmask 1039360   ;;  %vm454_vm15 = vcmask 130048  }
  0x18   : > { %s679_s6 = sshll.u32 %s190_s5, 2  ;;  %s891_s30 = smov 15  }
  0x19   : > { %vm208_vm0 = vcmp.ge.s32.totalorder %v200_v2, 1  ;;  %vm212_vm1 = vcmp.lt.s32.totalorder %v200_v2, 15  ;;  %s192_s11 = scalar_lea.vmem %s1106_s0, %s679_s6  ;;  %s892_s4 = smov 112  }
  0x1a   : > { %v680_v4 = vsel %vm208_vm0, 1.0, %v881_v3  ;;  %v681_v5 = vsel %vm212_vm1, 1.0, %v881_v3  ;;  %v984_v8 = vld [vmem:[%s192_s11] sm:$0xff]  ;;  %v986_v9 = vld [vmem:[%s192_s11 + $0x8] sm:$0xff]  ;;  %s893_s5 = smov 126   ;;  %s895_s6 = smov 127  }
  0x1b   : > { %v712_v6 = vpack.c.bf16 %v680_v4, %v680_v4  ;;  %v713_v7 = vpack.c.bf16 %v681_v5, %v681_v5  ;;  %v990_v10 = vcombine.low %v984_v8, %v986_v9  ;;  %v994_v11 = vcombine.high %v984_v8, %v986_v9  ;;  %v821_v5 = vld [vmem:[%s1107_s1 + $0x4] ss:$8 sps:$4 sm:$0xff]  }
  0x1c   : > { %702 = vmatprep.mubr.msk.bf16.mxu0 %vm454_vm15, %v821_v5  ;;  %vm375_vm0 = vcmask 769024   ;;  %vm435_vm1 = vcmask 924672  }
  0x1d   : > { %257 = vrot.lane.b32.xlu0 %v712_v6, %s882_s7  ;;  %241 = vrot.lane.b32.xlu1 %v712_v6, %s883_s8  ;;  %s896_s7 = smov 94   ;;  %s897_s8 = smov 113  }
  0x21   : > { %249 = vrot.lane.b32.xlu0 %v713_v7, %s884_s21  ;;  %233 = vrot.lane.b32.xlu1 %v713_v7, %s885_s22 }
  0x25   : > { %265 = vrot.lane.b32.xlu0 %v713_v7, %s886_s24  ;;  %357 = vrot.lane.b32.xlu1 %v990_v10, %s887_s25 }
  0x29   : > { %359 = vrot.lane.b32.xlu0 %v994_v11, %s887_s25  ;;  %323 = vrot.lane.b32.xlu1 %v990_v10, %s888_s26 }
  0x8f   : > { %v258_v12 = vpop.permute.xlu0 %257  ;;  %v242_v14 = vpop.permute.xlu1 %241 }
  0x90   : > { %v259_v13 = vrot.slane %v258_v12, 4  ;;  %v243_v23 = vrot.slane %v242_v14, 4 }
  0x92   : > { %v261_v15 = vsel %vm260_vm2, %v259_v13, %v258_v12  ;;  %v245_v29 = vsel %vm244_vm4, %v243_v23, %v242_v14 }
  0x93   : > { %v263_v16 = vmul.bf16 %v261_v15, %v984_v8  ;;  %v264_v17 = vmul.bf16 %v261_v15, %v986_v9  ;;  %v250_v18 = vpop.permute.xlu0 %249  ;;  %v234_v26 = vpop.permute.xlu1 %233  ;;  %v247_v31 = vmul.bf16 %v245_v29, %v984_v8  ;;  %v248_v32 = vmul.bf16 %v245_v29, %v986_v9 }
  0x94   : > { %v251_v19 = vrot.slane %v250_v18, 4  ;;  %v235_v30 = vrot.slane %v234_v26, 4 }
  0x95   : > { %v695_v20 = vcombine.high %v263_v16, %v264_v17  ;;  %v694_v21 = vcombine.low %v263_v16, %v264_v17  ;;  %v691_v38 = vcombine.high %v247_v31, %v248_v32  ;;  %v690_v39 = vcombine.low %v247_v31, %v248_v32 }
  0x96   : > { %v253_v22 = vsel %vm252_vm3, %v251_v19, %v250_v18  ;;  %v237_v34 = vsel %vm236_vm5, %v235_v30, %v234_v26 }
  0x97   : > { %v255_v24 = vmul.bf16 %v253_v22, %v984_v8  ;;  %v256_v25 = vmul.bf16 %v253_v22, %v986_v9  ;;  %353 = vrot.lane.b32.xlu0 %v695_v20, %s889_s28  ;;  %351 = vrot.lane.b32.xlu1 %v694_v21, %s889_s28  ;;  %v266_v33 = vpop.permute.xlu0 %265  ;;  %v239_v36 = vmul.bf16 %v237_v34, %v984_v8  ;;  %v358_v49 = vpop.permute.xlu1 %357  ;;  %v216_v20 = vld [vmem:[%s1108_s2] sm:$0xff] }
  0x98   : > { %v267_v35 = vrot.slane %v266_v33, 4  ;;  %v240_v37 = vmul.bf16 %v237_v34, %v986_v9 }
  0x99   : > { %v693_v27 = vcombine.high %v255_v24, %v256_v25  ;;  %v692_v28 = vcombine.low %v255_v24, %v256_v25 }
  0x9a   : > { %v269_v40 = vsel %vm268_vm6, %v267_v35, %v266_v33  ;;  %v689_v41 = vcombine.high %v239_v36, %v240_v37  ;;  %v688_v42 = vcombine.low %v239_v36, %v240_v37 }
  0x9b   : > { %339 = vrot.lane.b32.xlu0 %v693_v27, %s890_s29  ;;  %337 = vrot.lane.b32.xlu1 %v692_v28, %s890_s29  ;;  %v271_v43 = vmul.bf16 %v269_v40, %v984_v8  ;;  %v272_v44 = vmul.bf16 %v269_v40, %v986_v9  ;;  %v360_v48 = vpop.permute.xlu0 %359  ;;  %v324_v51 = vpop.permute.xlu1 %323 }
  0x9c   : > { %v362_v50 = vsel %vm361_vm7, %v358_v49, %v360_v48 }
  0x9d   : > { %v696_v46 = vcombine.low %v271_v43, %v272_v44  ;;  %v697_v47 = vcombine.high %v271_v43, %v272_v44 }
  0x9f   : > { %325 = vrot.lane.b32.xlu0 %v994_v11, %s888_s26  ;;  %222 = vrot.lane.b32.xlu1 %v712_v6, %s891_s30  ;;  %s181_s30 = sand.u32 1, %s855_s12   ;;  %s708_s12 = sshll.u32 (%p964_p5), %s867_s15, 3 }
  0xa3   : > { %319 = vrot.lane.b32.xlu0 %v691_v38, %s892_s4  ;;  %317 = vrot.lane.b32.xlu1 %v690_v39, %s892_s4  ;;  %s676_s4 = sshll.u32 %s181_s30, 4 }
  0xa7   : > { %305 = vrot.lane.b32.xlu0 %v689_v41, %s893_s5  ;;  %303 = vrot.lane.b32.xlu1 %v688_v42, %s893_s5  ;;  %s183_s5 = scalar_lea.vmem [#allocation2], %s676_s4 }
  0xab   : > { %289 = vrot.lane.b32.xlu0 %v990_v10, %s895_s6  ;;  %291 = vrot.lane.b32.xlu1 %v994_v11, %s895_s6  ;;  %v824_v10 = vld [vmem:[%s1107_s1 + $0x14] ss:$8 sps:$4 sm:$0xff]   ;;  %s542_s6 = sadd.s32 (%p964_p5), %s863_s14, %s708_s12 }
  0xac   : > { %703 = vmatprep.mubr.msk.bf16.mxu1 %vm454_vm15, %v824_v10 }
  0xaf   : > { %371 = vrot.lane.b32.xlu0 %v696_v46, %s896_s7  ;;  %373 = vrot.lane.b32.xlu1 %v697_v47, %s896_s7  ;;  %v819_v46 = vld [vmem:[%s1107_s1] ss:$8 sps:$4 sm:$0xff]   ;;  %v822_v47 = vld [vmem:[%s1107_s1 + $0x10] ss:$8 sps:$4 sm:$0xff]   ;;  %s709_s7 = sshll.u32 (%p964_p5), %s542_s6, 2 }
  0xb0   : > { %s544_s10 = scalar_lea.vmem (%p964_p5), %s1109_s3, %s709_s7 }
  0xb3   : > { %427 = vrot.lane.b32.xlu0 %v362_v50, %s897_s8  ;;  %429 = vrot.lane.b32.xlu1 %v360_v48, %s897_s8 }
 0x109   : > { %v354_v52 = vpop.permute.xlu0 %353  ;;  %v352_v53 = vpop.permute.xlu1 %351 }
 0x10a   : > { %425 = vrot.lane.b32.xlu1 %v354_v52, %s897_s8  ;;  %v356_v54 = vsel %vm355_vm8, %v352_v53, %v354_v52 }
 0x10b   : > { %423 = vrot.lane.b32.xlu0 %v356_v54, %s897_s8 }
 0x10d   : > { %v340_v55 = vpop.permute.xlu0 %339  ;;  %v338_v56 = vpop.permute.xlu1 %337 }
 0x10e   : > { %421 = vrot.lane.b32.xlu1 %v340_v55, %s897_s8  ;;  %v342_v57 = vsel %vm341_vm9, %v338_v56, %v340_v55 }
 0x10f   : > { %419 = vrot.lane.b32.xlu0 %v342_v57, %s897_s8 }
 0x111   : > { %v326_v58 = vpop.permute.xlu0 %325  ;;  %v223_v59 = vpop.permute.xlu1 %222 }
 0x112   : > { %417 = vrot.lane.b32.xlu1 %v326_v58, %s897_s8  ;;  %v328_v60 = vsel %vm327_vm10, %v324_v51, %v326_v58  ;;  %v224_v61 = vrot.slane %v223_v59, 4 }
 0x113   : > { %415 = vrot.lane.b32.xlu0 %v328_v60, %s897_s8 }
 0x114   : > { %v226_v1 = vsel %vm225_vm12, %v224_v61, %v223_v59 }
 0x115   : > { %v320_v62 = vpop.permute.xlu0 %319  ;;  %v318_v63 = vpop.permute.xlu1 %317  ;;  %v228_v6 = vmul.bf16 %v226_v1, %v984_v8  ;;  %v229_v7 = vmul.bf16 %v226_v1, %v986_v9 }
 0x116   : > { %413 = vrot.lane.b32.xlu1 %v320_v62, %s897_s8  ;;  %v322_v0 = vsel %vm321_vm11, %v318_v63, %v320_v62 }
 0x117   : > { %411 = vrot.lane.b32.xlu0 %v322_v0, %s897_s8  ;;  %v685_v14 = vcombine.high %v228_v6, %v229_v7  ;;  %v684_v16 = vcombine.low %v228_v6, %v229_v7 }
 0x119   : > { %v306_v2 = vpop.permute.xlu0 %305  ;;  %v304_v3 = vpop.permute.xlu1 %303 }
 0x11a   : > { %409 = vrot.lane.b32.xlu1 %v306_v2, %s897_s8  ;;  %v308_v4 = vsel %vm307_vm13, %v304_v3, %v306_v2 }
 0x11b   : > { %407 = vrot.lane.b32.xlu0 %v308_v4, %s897_s8 }
 0x11d   : > { %v290_v11 = vpop.permute.xlu0 %289  ;;  %v292_v12 = vpop.permute.xlu1 %291 }
 0x11e   : > { %405 = vrot.lane.b32.xlu1 %v292_v12, %s897_s8  ;;  %v294_v13 = vsel %vm293_vm14, %v290_v11, %v292_v12 }
 0x11f   : > { %403 = vrot.lane.b32.xlu0 %v294_v13, %s897_s8 }
 0x121   : > { %v372_v15 = vpop.permute.xlu0 %371  ;;  %v374_v17 = vpop.permute.xlu1 %373 }
 0x122   : > { %401 = vrot.lane.b32.xlu1 %v685_v14, %s897_s8  ;;  %v376_v18 = vsel %vm375_vm0, %v372_v15, %v374_v17 }
 0x123   : > { %399 = vrot.lane.b32.xlu0 %v684_v16, %s897_s8 }
 0x125   : > { %v428_v8 = vpop.permute.xlu0 %427  ;;  %v430_v9 = vpop.permute.xlu1 %429 }
 0x126   : > { %433 = vrot.lane.b32.xlu1 %v374_v17, %s897_s8  ;;  %v443_v19 = vsel %vm435_vm1, %v428_v8, %v430_v9 }
 0x127   : > { %431 = vrot.lane.b32.xlu0 %v376_v18, %s897_s8  ;;  %462 = vmatpush1.bf16.msra.mxu0 %v443_v19 }
 0x128   : > { %734 = vmatpush1.bf16.msra.mxu1 %v443_v19  ;;  %463 = vmatprep.subr.bf16.mxu0 %v894_v45 }
 0x129   : > { %726 = vmatprep.subr.bf16.mxu1 %v894_v45 }
 0x12b   : > { %512 = vperm.xlu0 %816, %v216_v20  }
 0x17c   : > { %v426_v21 = vpop.permute.xlu1 %425 }
 0x17d   : > { %v424_v22 = vpop.permute.xlu0 %423 }
 0x17e   : > { %v442_v23 = vsel %vm435_vm1, %v424_v22, %v426_v21 }
 0x17f   : > { %464 = vmatpush1.bf16.msra.mxu0 %v442_v23  ;;  %735 = vmatpush1.bf16.msra.mxu1 %v442_v23 }
 0x180   : > { %v422_v24 = vpop.permute.xlu1 %421  ;;  %465 = vmatprep.subr.bf16.mxu0 %v894_v45  ;;  %727 = vmatprep.subr.bf16.mxu1 %v894_v45 }
 0x181   : > { %v420_v25 = vpop.permute.xlu0 %419 }
 0x182   : > { %v441_v26 = vsel %vm435_vm1, %v420_v25, %v422_v24 }
 0x183   : > { %466 = vmatpush1.bf16.msra.mxu0 %v441_v26  ;;  %736 = vmatpush1.bf16.msra.mxu1 %v441_v26 }
 0x184   : > { %v418_v27 = vpop.permute.xlu1 %417  ;;  %467 = vmatprep.subr.bf16.mxu0 %v894_v45  ;;  %728 = vmatprep.subr.bf16.mxu1 %v894_v45 }
 0x185   : > { %v416_v28 = vpop.permute.xlu0 %415 }
 0x186   : > { %v440_v29 = vsel %vm435_vm1, %v416_v28, %v418_v27 }
 0x187   : > { %468 = vmatpush1.bf16.msra.mxu0 %v440_v29  ;;  %737 = vmatpush1.bf16.msra.mxu1 %v440_v29 }
 0x188   : > { %v414_v30 = vpop.permute.xlu1 %413  ;;  %469 = vmatprep.subr.bf16.mxu0 %v894_v45  ;;  %729 = vmatprep.subr.bf16.mxu1 %v894_v45 }
 0x189   : > { %v412_v31 = vpop.permute.xlu0 %411 }
 0x18a   : > { %v439_v32 = vsel %vm435_vm1, %v412_v31, %v414_v30 }
 0x18b   : > { %470 = vmatpush1.bf16.msra.mxu0 %v439_v32  ;;  %738 = vmatpush1.bf16.msra.mxu1 %v439_v32 }
 0x18c   : > { %v410_v33 = vpop.permute.xlu1 %409  ;;  %471 = vmatprep.subr.bf16.mxu0 %v894_v45  ;;  %730 = vmatprep.subr.bf16.mxu1 %v894_v45 }
 0x18d   : > { %v408_v34 = vpop.permute.xlu0 %407 }
 0x18e   : > { %v438_v35 = vsel %vm435_vm1, %v408_v34, %v410_v33 }
 0x18f   : > { %472 = vmatpush1.bf16.msra.mxu0 %v438_v35  ;;  %739 = vmatpush1.bf16.msra.mxu1 %v438_v35 }
 0x190   : > { %v406_v36 = vpop.permute.xlu1 %405  ;;  %473 = vmatprep.subr.bf16.mxu0 %v894_v45  ;;  %731 = vmatprep.subr.bf16.mxu1 %v894_v45 }
 0x191   : > { %v404_v37 = vpop.permute.xlu0 %403 }
 0x192   : > { %v437_v38 = vsel %vm435_vm1, %v404_v37, %v406_v36 }
 0x193   : > { %474 = vmatpush1.bf16.msra.mxu0 %v437_v38  ;;  %740 = vmatpush1.bf16.msra.mxu1 %v437_v38 }
 0x194   : > { %v402_v39 = vpop.permute.xlu1 %401  ;;  %475 = vmatprep.subr.bf16.mxu0 %v894_v45  ;;  %732 = vmatprep.subr.bf16.mxu1 %v894_v45 }
 0x195   : > { %v400_v40 = vpop.permute.xlu0 %399 }
 0x196   : > { %v436_v41 = vsel %vm435_vm1, %v400_v40, %v402_v39 }
 0x197   : > { %476 = vmatpush1.bf16.msra.mxu0 %v436_v41  ;;  %741 = vmatpush1.bf16.msra.mxu1 %v436_v41 }
 0x198   : > { %v434_v42 = vpop.permute.xlu1 %433  ;;  %491 = vmatprep.subr.bf16.mxu0 %v894_v45  ;;  %733 = vmatprep.subr.bf16.mxu1 %v894_v45 }
 0x199   : > { %v432_v43 = vpop.permute.xlu0 %431 }
 0x19a   : > { %v444_v44 = vsel %vm435_vm1, %v432_v43, %v434_v42 }
 0x19b   : > { %492 = vmatpush2.bf16.msra.mxu0 %v444_v44  ;;  %742 = vmatpush2.bf16.msra.mxu1 %v444_v44 }
 0x19e   : > { %494 = vmatmul.mubr.bf16.vlgmr.msra.gmra.mxu0 %v819_v46  ;;  %502 = vmatmul.mubr.bf16.vlgmr.msra.gmra.mxu1 %v822_v47 }
 0x1a6   : > { %v513_v48 = vpop.permute.xlu0 %512 }
 0x25e   : > { %v495_v49 = vpop.f32.mrf.mxu0  ;;  %v503_v50 = vpop.f32.mrf.mxu1 }
 0x25f   : > { %v515_v52 = vadd.f32 %v513_v48, %v495_v49  ;;  %v524_v53 = vadd.f32 %v513_v48, %v503_v50 }
 0x260   : > { %v497_v51 = vpop.f32.mrf.mxu0  ;;  %v505_v45 = vpop.f32.mrf.mxu1 }
 0x261   : > { %v516_v60 = vmax.f32 %v515_v52, 0.0  ;;  %v525_v61 = vmax.f32 %v524_v53, 0.0 }
 0x262   : > { %v498_v54 = vpop.f32.mrf.mxu0  ;;  %v506_v55 = vpop.f32.mrf.mxu1 }
 0x263   : > { %v519_v56 = vadd.f32 %v513_v48, %v498_v54  ;;  %v529_v57 = vadd.f32 %v513_v48, %v506_v55 }
 0x264   : > { %v500_v58 = vpop.f32.mrf.mxu0  ;;  %v508_v59 = vpop.f32.mrf.mxu1 }
 0x265   : > { %v520_v62 = vmax.f32 %v519_v56, 0.0  ;;  %v530_v63 = vmax.f32 %v529_v57, 0.0  ;;  %540 = sbr.rel (!%p964_p5) target bundleno = 627 (0x273), region = 36 }
 0x267   : > { %v717_v0 = vpack.c.bf16 %v520_v62, %v516_v60  ;;  %v722_v1 = vpack.c.bf16 %v530_v63, %v525_v61 }
 0x269   : > { %718 = vst [vmem:[%s183_s5] sm:$0xff] %v717_v0   ;;  %724 = vst [vmem:[%s183_s5 + $0x8] sm:$0xff] %v722_v1  }
 0x270   : > { %v561_v2 = vld [vmem:[%s183_s5] sm:$0xf]  ;;  %v563_v3 = vld [vmem:[%s183_s5 + $0x4] sm:$0xf]  ;;  %v565_v4 = vld [vmem:[%s183_s5 + $0x8] sm:$0xf] }
 0x271   : > { %v567_v5 = vld [vmem:[%s183_s5 + $0xc] sm:$0xf]  ;;  %562 = vst [vmem:[%s544_s10] sm:$0xf] %v561_v2  ;;  %564 = vst [vmem:[%s544_s10 + $0x8] sm:$0xf] %v563_v3 }
 0x272   : > { %566 = vst [vmem:[%s544_s10 + $0x10] sm:$0xf] %v565_v4  ;;  %568 = vst [vmem:[%s544_s10 + $0x18] sm:$0xf] %v567_v5 }
 0x273 PF: > { %s13_s18 = sadd.s32 1, %s879_s18   ;;  %s1111_s12 = smov %s859_s13 }
 0x274   : > { %p10_p11 = scmp.ge.s32.totalorder %s13_s18, 6   ;;  %s1112_s13 = smov %s975_s27 }
 0x275   : > { %s1113_s14 = smov %s871_s16  ;;  %s1114_s15 = smov %s875_s17 }
 0x276   : > { %s1115_s16 = smov %s1118_s19  ;;  %s1116_s17 = smov %s1122_s20 }
 0x277   :  { %12 = sbr.rel (!%p10_p11) target bundleno = 4 (0x4), region = 106 }

</bundles_post_ra>
